<compile_context>
chip_gen: v7x
topology: tpu7x:2x2x1
jax: 0.10.0
libtpu: 0.0.40
codegen_flags: <defaults>
</compile_context>

<pallas_src>
import functools

import jax
import jax.numpy as jnp
from jax.experimental import pallas as pl
from jax.experimental.pallas import tpu as pltpu


# ----------------------------------------------------------------------------
# Fused kernel
# ----------------------------------------------------------------------------
def _fused_kernel(L2, T2, Bb,
                  xg_ref, w1p_ref, b1_ref, w2_ref, b2_ref,
                  wf1_ref, bf1_ref, wf2_ref, bf2_ref,
                  o1_ref, o2_ref, acc_ref):
    """grid = (batch_block, L2_tile).  Axis 1 is the pooling reduction."""
    t = pl.program_id(1)
    nt = pl.num_programs(1)
    g = T2 // 8

    @pl.when(t == 0)
    def _():
        acc_ref[...] = jnp.zeros_like(acc_ref)

    # ---- conv1 (+ReLU): ONE matmul that directly emits the conv2 patch -----
    # xg[s, r] = x[8s + r]  (r < 24, lanes 24..31 zero)
    # w1p[r, 16j + c] = w1[c, r - 4j]  (0 elsewhere)   =>
    # patch[s, 16j + c] = relu(sum_r x[8s + 4j + r] * w1[c, r] + b1[c])
    #                   = relu(y1[c, 2s + j])
    xw = xg_ref[...].reshape(Bb * T2, 32)                          # (Bb*T2, 32)
    patch = jnp.maximum(
        jnp.dot(xw, w1p_ref[...], preferred_element_type=jnp.float32)
        + b1_ref[...], 0.0)                                        # (Bb*T2, 64) f32

    # ---- conv2 (+bias +ReLU): bf16 MXU matmul, f32 accumulate ---------------
    z = jnp.dot(patch.astype(jnp.bfloat16), w2_ref[...],
                preferred_element_type=jnp.float32)
    z = jnp.maximum(z + b2_ref[...], 0.0)                          # (Bb*T2, 512) f32

    # ---- global-average-pool partial sums (sublane-partial, VALU only) ------
    @pl.when(t == nt - 1)
    def _():
        # Only the final tile contains padded rows (q >= L2): mask them here.
        q = t * T2 + jax.lax.broadcasted_iota(jnp.int32, (1, T2, 1), 1)
        zm = jnp.where(q < L2, z.reshape(Bb, T2, 512), 0.0)
        for bi in range(Bb):
            acc_ref[bi] += zm[bi].reshape(g, 8, 512).sum(axis=0)

    @pl.when(t != nt - 1)
    def _():
        z3 = z.reshape(Bb, T2, 512)
        for bi in range(Bb):
            acc_ref[bi] += z3[bi].reshape(g, 8, 512).sum(axis=0)

    # ---- epilogue: 8->1 sublane reduce, mean pool, classifier, stores -------
    @pl.when(t == nt - 1)
    def _():
        inv = 1.0 / float(L2)
        feat = jnp.concatenate(
            [acc_ref[bi].sum(axis=0, keepdims=True) for bi in range(Bb)],
            axis=0) * inv                                          # (Bb, 512)
        h = jnp.maximum(
            jnp.dot(feat.astype(jnp.bfloat16), wf1_ref[...],
                    preferred_element_type=jnp.float32) + bf1_ref[...], 0.0)
        o2_ref[...] = h.reshape(o2_ref.shape)                      # hidden (fc1)
        o1 = jnp.dot(h.astype(jnp.bfloat16), wf2_ref[...],
                     preferred_element_type=jnp.float32) + bf2_ref[...]
        o1_ref[...] = o1.reshape(o1_ref.shape)                     # logits


def _round_up(v, m):
    return ((v + m - 1) // m) * m


# ----------------------------------------------------------------------------
# Forward pass (matches PreTrainingNet.forward)
# ----------------------------------------------------------------------------
def pretraining_net_forward(params, x, *, max_tile=1024, batch_block=8):
    B, cin, L = x.shape
    assert cin == 1, "assumed FeatureExtractor takes a single input channel"
    x2 = x.reshape(B, L).astype(jnp.float32)

    L1 = (L - 8) // 4 + 1          # conv1: k=8, s=4
    L2 = (L1 - 4) // 2 + 1         # conv2: k=4, s=2
    assert L1 >= 4 and L2 >= 1

    # Batch blocking: keep >=2 batch blocks so both v7x TensorCores get work.
    Bb = max(1, min(batch_block, B // 2)) if B >= 2 else 1
    Bp = -(-B // Bb) * Bb
    nB = Bp // Bb

    # L2 tile: big (amortize per-step overhead) but Bb*T2 <= 2048 rows so the
    # (rows, 512) f32 conv2 tile stays ~4 MB (fits v5e's default scoped VMEM).
    mt = max(8, (max_tile // 8) * 8)
    t_cap = max(8, ((2048 // Bb) // 8) * 8)
    T2 = max(8, min(mt, _round_up(L2, 8), t_cap))
    nT2 = -(-L2 // T2)
    Sg = nT2 * T2                  # regrouped rows per batch row (no halo)

    # Regroup the raw signal: xg[b, s, r] = x[b, 8s + r], r in [0, 24), pad->32.
    need = 8 * Sg + 24
    xp = jnp.pad(x2, ((0, Bp - B), (0, max(0, need - L))))[:, :need]
    xg = jnp.concatenate(
        [xp[:, 0:8 * Sg].reshape(Bp, Sg, 8),
         xp[:, 8:8 * Sg + 8].reshape(Bp, Sg, 8),
         xp[:, 16:8 * Sg + 16].reshape(Bp, Sg, 8)], axis=-1)       # (Bp, Sg, 24)
    xg = jnp.pad(xg, ((0, 0), (0, 0), (0, 8)))                     # (Bp, Sg, 32)

    # ---- weights: re-laid-out, zero-padded lane-dense, matmul operands bf16 -
    w1k = params["conv1_w"].reshape(16, 8).astype(jnp.float32)     # (c, r)
    w1p = jnp.zeros((32, 64), jnp.float32)
    for j in range(4):             # block-shifted conv1 weight -> patch matmul
        w1p = w1p.at[4 * j:4 * j + 8, 16 * j:16 * (j + 1)].set(w1k.T)
    b1t = jnp.tile(params["conv1_b"].astype(jnp.float32), 4).reshape(1, 64)

    w2 = jnp.transpose(params["conv2_w"], (2, 1, 0)).reshape(64, 469)
    w2 = jnp.pad(w2, ((0, 0), (0, 512 - 469))).astype(jnp.bfloat16)      # (64, 512)
    b2 = jnp.pad(params["conv2_b"], (0, 512 - 469)).reshape(1, 512).astype(jnp.float32)
    wf1 = jnp.pad(params["fc1_w"], ((0, 512 - 469), (0, 128 - 50))).astype(jnp.bfloat16)
    bf1 = jnp.pad(params["fc1_b"], (0, 128 - 50)).reshape(1, 128).astype(jnp.float32)
    wf2 = jnp.pad(params["fc2_w"], ((0, 128 - 50), (0, 128 - 5))).astype(jnp.bfloat16)
    bf2 = jnp.pad(params["fc2_b"], (0, 128 - 5)).reshape(1, 128).astype(jnp.float32)

    flops = int(2 * Bp * Sg * (32 * 64 + 64 * 512)                 # conv1-patch + conv2
                + 2 * Bp * (512 * 128 + 128 * 128))                # classifier
    bytes_accessed = int(4 * xg.size
                         + 4 * (w1p.size + b1t.size + b2.size + bf1.size + bf2.size)
                         + 2 * (w2.size + wf1.size + wf2.size)
                         + 4 * 2 * nB * Bb * 128)

    kernel = functools.partial(_fused_kernel, L2, T2, Bb)
    o1p, o2p = pl.pallas_call(
        kernel,
        out_shape=(jax.ShapeDtypeStruct((nB, Bb, 128), jnp.float32),
                   jax.ShapeDtypeStruct((nB, Bb, 128), jnp.float32)),
        grid=(nB, nT2),
        in_specs=[
            pl.BlockSpec((Bb, T2, 32), lambda b, t: (b, t, 0)),    # signal slab tile
            pl.BlockSpec((32, 64), lambda b, t: (0, 0)),           # conv1 patch weight
            pl.BlockSpec((1, 64), lambda b, t: (0, 0)),            # conv1 bias (tiled x4)
            pl.BlockSpec((64, 512), lambda b, t: (0, 0)),          # conv2 w (bf16, padded)
            pl.BlockSpec((1, 512), lambda b, t: (0, 0)),           # conv2 bias
            pl.BlockSpec((512, 128), lambda b, t: (0, 0)),         # fc1 w (bf16)
            pl.BlockSpec((1, 128), lambda b, t: (0, 0)),           # fc1 bias
            pl.BlockSpec((128, 128), lambda b, t: (0, 0)),         # fc2 w (bf16)
            pl.BlockSpec((1, 128), lambda b, t: (0, 0)),           # fc2 bias
        ],
        out_specs=(pl.BlockSpec((1, Bb, 128), lambda b, t: (b, 0, 0)),
                   pl.BlockSpec((1, Bb, 128), lambda b, t: (b, 0, 0))),
        scratch_shapes=[pltpu.VMEM((Bb, 8, 512), jnp.float32)],    # pool accumulator
        compiler_params=pltpu.CompilerParams(
            dimension_semantics=("parallel", "arbitrary")),
        cost_estimate=pl.CostEstimate(
            flops=flops, transcendentals=0, bytes_accessed=bytes_accessed),
    )(xg, w1p, b1t, w2, b2, wf1, bf1, wf2, bf2)

    output1 = o1p.reshape(Bp, 128)[:B, :5]      # logits        (B, 5)
    output2 = o2p.reshape(Bp, 128)[:B, :50]     # hidden (fc1)  (B, 50)
    return output1, output2


# ----------------------------------------------------------------------------
# Parameters (deterministic, PyTorch-style uniform(-1/sqrt(fan_in), +))
# ----------------------------------------------------------------------------
def _uniform(key, shape, fan_in):
    bound = 1.0 / jnp.sqrt(jnp.float32(fan_in))
    return jax.random.uniform(key, shape, jnp.float32, -bound, bound)


def init_params(key):
    ks = jax.random.split(key, 8)
    p = {}
    p["conv1_w"] = _uniform(ks[0], (16, 1, 8), 1 * 8)       # (Cout, Cin, k)
    p["conv1_b"] = _uniform(ks[1], (16,), 1 * 8)
    p["conv2_w"] = _uniform(ks[2], (469, 16, 4), 16 * 4)
    p["conv2_b"] = _uniform(ks[3], (469,), 16 * 4)
    p["fc1_w"] = _uniform(ks[4], (469, 50), 469)            # stored pre-transposed
    p["fc1_b"] = _uniform(ks[5], (50,), 469)
    p["fc2_w"] = _uniform(ks[6], (50, 5), 50)
    p["fc2_b"] = _uniform(ks[7], (5,), 50)
    return p


# ----------------------------------------------------------------------------
# Pure-JAX f32 reference (correctness check of the fused kernel)
# ----------------------------------------------------------------------------
def _reference_forward(params, x):
    B, _, L = x.shape
    x2 = x[:, 0, :]
    L1 = (L - 8) // 4 + 1
    idx1 = jnp.arange(L1)[:, None] * 4 + jnp.arange(8)[None, :]
    p1 = x2[:, idx1]                                                  # (B, L1, 8)
    y1 = jax.nn.relu(jnp.einsum("blk,ck->blc", p1, params["conv1_w"][:, 0, :])
                     + params["conv1_b"])                             # (B, L1, 16)
    L2 = (L1 - 4) // 2 + 1
    idx2 = jnp.arange(L2)[:, None] * 2 + jnp.arange(4)[None, :]
    p2 = y1[:, idx2, :]                                               # (B, L2, 4, 16)
    y2 = jax.nn.relu(jnp.einsum("bljc,ncj->bln", p2, params["conv2_w"])
                     + params["conv2_b"])                             # (B, L2, 469)
    feat = jnp.mean(y2, axis=1)
    h = jax.nn.relu(feat @ params["fc1_w"] + params["fc1_b"])
    o1 = h @ params["fc2_w"] + params["fc2_b"]
    return o1, h


# ----------------------------------------------------------------------------
if __name__ == "__main__":
    key = jax.random.PRNGKey(0)
    pkey, xkey, xkey2 = jax.random.split(key, 3)
    params = init_params(pkey)
    fwd = jax.jit(pretraining_net_forward)

    # The conv2/fc matmuls run in bf16 on the MXU (f32 accumulate), so the
    # comparison against the all-f32 reference uses an explicit bf16 tolerance.
    TOL = dict(atol=2e-2, rtol=2e-2)

    # Case 1: tiny signal (B=2, L=128) -> single L2 tile with a ragged tail.
    x = jax.random.normal(xkey, (2, 1, 128), dtype=jnp.float32)
    out1, out2 = fwd(params, x)
    jax.block_until_ready((out1, out2))
    ref1, ref2 = _reference_forward(params, x)
    assert out1.shape == (2, 5) and out2.shape == (2, 50)
    assert bool(jnp.allclose(out1, ref1, **TOL))
    assert bool(jnp.allclose(out2, ref2, **TOL))

    # Case 2: multi-tile reduction + batch blocking & padding (B=5, L=9000).
    xb = jax.random.normal(xkey2, (5, 1, 9000), dtype=jnp.float32)
    o1b, o2b = fwd(params, xb)
    jax.block_until_ready((o1b, o2b))
    r1b, r2b = _reference_forward(params, xb)
    assert o1b.shape == (5, 5) and o2b.shape == (5, 50)
    assert bool(jnp.allclose(o1b, r1b, **TOL))
    assert bool(jnp.allclose(o2b, r2b, **TOL))

    print("KERNEL_OK")
</pallas_src>

<mosaic_0001>
module attributes {stable_mosaic.version = 11 : i64} {
  func.func @_fused_kernel(%arg0: i32, %arg1: i32, %arg2: memref<1x16x32xf32, #tpu.memory_space<vmem>>, %arg3: memref<32x64xf32, #tpu.memory_space<vmem>>, %arg4: memref<1x64xf32, #tpu.memory_space<vmem>>, %arg5: memref<64x512xbf16, #tpu.memory_space<vmem>>, %arg6: memref<1x512xf32, #tpu.memory_space<vmem>>, %arg7: memref<512x128xbf16, #tpu.memory_space<vmem>>, %arg8: memref<1x128xf32, #tpu.memory_space<vmem>>, %arg9: memref<128x128xbf16, #tpu.memory_space<vmem>>, %arg10: memref<1x128xf32, #tpu.memory_space<vmem>>, %arg11: memref<1x1x128xf32, #tpu.memory_space<vmem>>, %arg12: memref<1x1x128xf32, #tpu.memory_space<vmem>>, %arg13: memref<1x8x512xf32, #tpu.memory_space<vmem>>) attributes {dimension_semantics = [#tpu.dimension_semantics<parallel>, #tpu.dimension_semantics<arbitrary>], iteration_bounds = array<i64: 2, 1>, scalar_prefetch = 0 : i64, scratch_operands = 1 : i64, tpu.core_type = #tpu.core_type<tc>, window_params = [{transform_indices = @transform_0, window_bounds = array<i64: 1, 16, 32>}, {pipeline_mode = #tpu.pipeline_mode<synchronous>, transform_indices = @transform_1, window_bounds = array<i64: 32, 64>}, {pipeline_mode = #tpu.pipeline_mode<synchronous>, transform_indices = @transform_2, window_bounds = array<i64: 1, 64>}, {pipeline_mode = #tpu.pipeline_mode<synchronous>, transform_indices = @transform_3, window_bounds = array<i64: 64, 512>}, {pipeline_mode = #tpu.pipeline_mode<synchronous>, transform_indices = @transform_4, window_bounds = array<i64: 1, 512>}, {pipeline_mode = #tpu.pipeline_mode<synchronous>, transform_indices = @transform_5, window_bounds = array<i64: 512, 128>}, {pipeline_mode = #tpu.pipeline_mode<synchronous>, transform_indices = @transform_6, window_bounds = array<i64: 1, 128>}, {pipeline_mode = #tpu.pipeline_mode<synchronous>, transform_indices = @transform_7, window_bounds = array<i64: 128, 128>}, {pipeline_mode = #tpu.pipeline_mode<synchronous>, transform_indices = @transform_8, window_bounds = array<i64: 1, 128>}, {transform_indices = @transform_9, window_bounds = array<i64: 1, 1, 128>}, {transform_indices = @transform_10, window_bounds = array<i64: 1, 1, 128>}]} {
    %c0_i32 = arith.constant 0 : i32
    %0 = arith.cmpi eq, %arg1, %c0_i32 : i32
    %1 = arith.extui %0 : i1 to i32
    %c0_i32_0 = arith.constant 0 : i32
    %2 = arith.cmpi ne, %1, %c0_i32_0 : i32
    scf.if %2 {
      %cst_20 = arith.constant 0.000000e+00 : f32
      %29 = vector.broadcast %cst_20 : f32 to vector<1x8x512xf32>
      %c0_21 = arith.constant 0 : index
      %c0_22 = arith.constant 0 : index
      %c0_23 = arith.constant 0 : index
      %30 = vector.load %arg13[%c0_21, %c0_22, %c0_23] : memref<1x8x512xf32, #tpu.memory_space<vmem>>, vector<1x8x512xf32>
      tpu.vector_store %arg13[%c0_21, %c0_22, %c0_23], %29 {strides = array<i32>} : memref<1x8x512xf32, #tpu.memory_space<vmem>>, vector<1x8x512xf32>,
    } else {
    }
    %c0 = arith.constant 0 : index
    %c0_1 = arith.constant 0 : index
    %c0_2 = arith.constant 0 : index
    %3 = vector.load %arg2[%c0, %c0_1, %c0_2] : memref<1x16x32xf32, #tpu.memory_space<vmem>>, vector<1x16x32xf32>
    %4 = vector.shape_cast %3 : vector<1x16x32xf32> to vector<16x32xf32>
    %c0_3 = arith.constant 0 : index
    %c0_4 = arith.constant 0 : index
    %5 = vector.load %arg3[%c0_3, %c0_4] : memref<32x64xf32, #tpu.memory_space<vmem>>, vector<32x64xf32>
    %cst = arith.constant dense<0.000000e+00> : vector<16x64xf32>
    %6 = tpu.matmul %4, %5, %cst {dimension_numbers = #tpu.dot_dimension_numbers<[1], [0], [0], [1], [0, 0, 1, 1], [], []>} : vector<16x32xf32>, vector<32x64xf32>, vector<16x64xf32> -> vector<16x64xf32>
    %c0_5 = arith.constant 0 : index
    %c0_6 = arith.constant 0 : index
    %7 = vector.load %arg4[%c0_5, %c0_6] : memref<1x64xf32, #tpu.memory_space<vmem>>, vector<1x64xf32>
    %8 = vector.broadcast %7 : vector<1x64xf32> to vector<16x64xf32>
    %9 = arith.addf %6, %8 : vector<16x64xf32>
    %cst_7 = arith.constant 0.000000e+00 : f32
    %10 = vector.broadcast %cst_7 : f32 to vector<16x64xf32>
    %11 = arith.maximumf %9, %10 : vector<16x64xf32>
    %12 = arith.truncf %11 : vector<16x64xf32> to vector<16x64xbf16>
    %c0_8 = arith.constant 0 : index
    %c0_9 = arith.constant 0 : index
    %13 = vector.load %arg5[%c0_8, %c0_9] : memref<64x512xbf16, #tpu.memory_space<vmem>>, vector<64x512xbf16>
    %cst_10 = arith.constant dense<0.000000e+00> : vector<16x512xf32>
    %14 = tpu.matmul %12, %13, %cst_10 {dimension_numbers = #tpu.dot_dimension_numbers<[1], [0], [0], [1], [0, 0, 1, 1], [], []>} : vector<16x64xbf16>, vector<64x512xbf16>, vector<16x512xf32> -> vector<16x512xf32>
    %c0_11 = arith.constant 0 : index
    %c0_12 = arith.constant 0 : index
    %15 = vector.load %arg6[%c0_11, %c0_12] : memref<1x512xf32, #tpu.memory_space<vmem>>, vector<1x512xf32>
    %16 = vector.broadcast %15 : vector<1x512xf32> to vector<16x512xf32>
    %17 = arith.addf %14, %16 : vector<16x512xf32>
    %cst_13 = arith.constant 0.000000e+00 : f32
    %18 = vector.broadcast %cst_13 : f32 to vector<16x512xf32>
    %19 = arith.maximumf %17, %18 : vector<16x512xf32>
    %c0_i32_14 = arith.constant 0 : i32
    %20 = arith.cmpi eq, %arg1, %c0_i32_14 : i32
    %21 = arith.extui %20 : i1 to i32
    %c0_i32_15 = arith.constant 0 : i32
    %22 = arith.cmpi ne, %21, %c0_i32_15 : i32
    scf.if %22 {
      %c16_i32 = arith.constant 16 : i32
      %29 = arith.muli %arg1, %c16_i32 : i32
      %30 = tpu.iota {dimensions = array<i32: 1>} : vector<1x16x1xi32>
      %31 = vector.broadcast %29 : i32 to vector<1x16x1xi32>
      %32 = arith.addi %31, %30 : vector<1x16x1xi32>
      %c14_i32 = arith.constant 14 : i32
      %33 = vector.broadcast %c14_i32 : i32 to vector<1x16x1xi32>
      %34 = arith.cmpi slt, %32, %33 : vector<1x16x1xi32>
      %35 = vector.shape_cast %19 : vector<16x512xf32> to vector<1x16x512xf32>
      %cst_20 = arith.constant 0.000000e+00 : f32
      %36 = vector.shape_cast %34 : vector<1x16x1xi1> to vector<1x16x1xi1>
      %37 = vector.broadcast %36 : vector<1x16x1xi1> to vector<1x16x512xi1>
      %38 = vector.broadcast %cst_20 : f32 to vector<1x16x512xf32>
      %39 = arith.select %37, %35, %38 : vector<1x16x512xi1>, vector<1x16x512xf32>
      %c0_21 = arith.constant 0 : index
      %c0_22 = arith.constant 0 : index
      %c0_23 = arith.constant 0 : index
      %40 = vector.load %arg13[%c0_21, %c0_22, %c0_23] : memref<1x8x512xf32, #tpu.memory_space<vmem>>, vector<1x8x512xf32>
      %41 = vector.shape_cast %40 : vector<1x8x512xf32> to vector<8x512xf32>
      %42 = vector.shape_cast %39 : vector<1x16x512xf32> to vector<16x512xf32>
      %43 = vector.shape_cast %42 : vector<16x512xf32> to vector<2x8x512xf32>
      %cst_24 = arith.constant dense<0.000000e+00> : vector<8x512xf32>
      %44 = vector.multi_reduction <add>, %43, %cst_24 [0] : vector<2x8x512xf32> to vector<8x512xf32>
      %45 = arith.addf %41, %44 : vector<8x512xf32>
      %c0_25 = arith.constant 0 : index
      %c0_26 = arith.constant 0 : index
      %c0_27 = arith.constant 0 : index
      %46 = vector.load %arg13[%c0_25, %c0_26, %c0_27] : memref<1x8x512xf32, #tpu.memory_space<vmem>>, vector<1x8x512xf32>
      %47 = vector.shape_cast %46 : vector<1x8x512xf32> to vector<8x512xf32>
      %48 = vector.shape_cast %45 : vector<8x512xf32> to vector<1x8x512xf32>
      tpu.vector_store %arg13[%c0_25, %c0_26, %c0_27], %48 {strides = array<i32>} : memref<1x8x512xf32, #tpu.memory_space<vmem>>, vector<1x8x512xf32>,
    } else {
    }
    %c0_i32_16 = arith.constant 0 : i32
    %23 = arith.cmpi ne, %arg1, %c0_i32_16 : i32
    %24 = arith.extui %23 : i1 to i32
    %c0_i32_17 = arith.constant 0 : i32
    %25 = arith.cmpi ne, %24, %c0_i32_17 : i32
    scf.if %25 {
      %29 = vector.shape_cast %19 : vector<16x512xf32> to vector<1x16x512xf32>
      %c0_20 = arith.constant 0 : index
      %c0_21 = arith.constant 0 : index
      %c0_22 = arith.constant 0 : index
      %30 = vector.load %arg13[%c0_20, %c0_21, %c0_22] : memref<1x8x512xf32, #tpu.memory_space<vmem>>, vector<1x8x512xf32>
      %31 = vector.shape_cast %30 : vector<1x8x512xf32> to vector<8x512xf32>
      %32 = vector.shape_cast %29 : vector<1x16x512xf32> to vector<16x512xf32>
      %33 = vector.shape_cast %32 : vector<16x512xf32> to vector<2x8x512xf32>
      %cst_23 = arith.constant dense<0.000000e+00> : vector<8x512xf32>
      %34 = vector.multi_reduction <add>, %33, %cst_23 [0] : vector<2x8x512xf32> to vector<8x512xf32>
      %35 = arith.addf %31, %34 : vector<8x512xf32>
      %c0_24 = arith.constant 0 : index
      %c0_25 = arith.constant 0 : index
      %c0_26 = arith.constant 0 : index
      %36 = vector.load %arg13[%c0_24, %c0_25, %c0_26] : memref<1x8x512xf32, #tpu.memory_space<vmem>>, vector<1x8x512xf32>
      %37 = vector.shape_cast %36 : vector<1x8x512xf32> to vector<8x512xf32>
      %38 = vector.shape_cast %35 : vector<8x512xf32> to vector<1x8x512xf32>
      tpu.vector_store %arg13[%c0_24, %c0_25, %c0_26], %38 {strides = array<i32>} : memref<1x8x512xf32, #tpu.memory_space<vmem>>, vector<1x8x512xf32>,
    } else {
    }
    %c0_i32_18 = arith.constant 0 : i32
    %26 = arith.cmpi eq, %arg1, %c0_i32_18 : i32
    %27 = arith.extui %26 : i1 to i32
    %c0_i32_19 = arith.constant 0 : i32
    %28 = arith.cmpi ne, %27, %c0_i32_19 : i32
    scf.if %28 {
      %c0_20 = arith.constant 0 : index
      %c0_21 = arith.constant 0 : index
      %c0_22 = arith.constant 0 : index
      %29 = vector.load %arg13[%c0_20, %c0_21, %c0_22] : memref<1x8x512xf32, #tpu.memory_space<vmem>>, vector<1x8x512xf32>
      %30 = vector.shape_cast %29 : vector<1x8x512xf32> to vector<8x512xf32>
      %cst_23 = arith.constant dense<0.000000e+00> : vector<512xf32>
      %31 = vector.multi_reduction <add>, %30, %cst_23 [0] : vector<8x512xf32> to vector<512xf32>
      %32 = vector.shape_cast %31 : vector<512xf32> to vector<1x512xf32>
      %cst_24 = arith.constant 0.0714285746 : f32
      %33 = vector.broadcast %cst_24 : f32 to vector<1x512xf32>
      %34 = arith.mulf %32, %33 : vector<1x512xf32>
      %35 = arith.truncf %34 : vector<1x512xf32> to vector<1x512xbf16>
      %c0_25 = arith.constant 0 : index
      %c0_26 = arith.constant 0 : index
      %36 = vector.load %arg7[%c0_25, %c0_26] : memref<512x128xbf16, #tpu.memory_space<vmem>>, vector<512x128xbf16>
      %cst_27 = arith.constant dense<0.000000e+00> : vector<1x128xf32>
      %37 = tpu.matmul %35, %36, %cst_27 {dimension_numbers = #tpu.dot_dimension_numbers<[1], [0], [0], [1], [0, 0, 1, 1], [], []>} : vector<1x512xbf16>, vector<512x128xbf16>, vector<1x128xf32> -> vector<1x128xf32>
      %c0_28 = arith.constant 0 : index
      %c0_29 = arith.constant 0 : index
      %38 = vector.load %arg8[%c0_28, %c0_29] : memref<1x128xf32, #tpu.memory_space<vmem>>, vector<1x128xf32>
      %39 = arith.addf %37, %38 : vector<1x128xf32>
      %cst_30 = arith.constant 0.000000e+00 : f32
      %40 = vector.broadcast %cst_30 : f32 to vector<1x128xf32>
      %41 = arith.maximumf %39, %40 : vector<1x128xf32>
      %42 = vector.shape_cast %41 : vector<1x128xf32> to vector<1x1x128xf32>
      %c0_31 = arith.constant 0 : index
      %c0_32 = arith.constant 0 : index
      %c0_33 = arith.constant 0 : index
      %43 = vector.load %arg12[%c0_31, %c0_32, %c0_33] : memref<1x1x128xf32, #tpu.memory_space<vmem>>, vector<1x1x128xf32>
      tpu.vector_store %arg12[%c0_31, %c0_32, %c0_33], %42 {strides = array<i32>} : memref<1x1x128xf32, #tpu.memory_space<vmem>>, vector<1x1x128xf32>,
      %44 = arith.truncf %41 : vector<1x128xf32> to vector<1x128xbf16>
      %c0_34 = arith.constant 0 : index
      %c0_35 = arith.constant 0 : index
      %45 = vector.load %arg9[%c0_34, %c0_35] : memref<128x128xbf16, #tpu.memory_space<vmem>>, vector<128x128xbf16>
      %cst_36 = arith.constant dense<0.000000e+00> : vector<1x128xf32>
      %46 = tpu.matmul %44, %45, %cst_36 {dimension_numbers = #tpu.dot_dimension_numbers<[1], [0], [0], [1], [0, 0, 1, 1], [], []>} : vector<1x128xbf16>, vector<128x128xbf16>, vector<1x128xf32> -> vector<1x128xf32>
      %c0_37 = arith.constant 0 : index
      %c0_38 = arith.constant 0 : index
      %47 = vector.load %arg10[%c0_37, %c0_38] : memref<1x128xf32, #tpu.memory_space<vmem>>, vector<1x128xf32>
      %48 = arith.addf %46, %47 : vector<1x128xf32>
      %49 = vector.shape_cast %48 : vector<1x128xf32> to vector<1x1x128xf32>
      %c0_39 = arith.constant 0 : index
      %c0_40 = arith.constant 0 : index
      %c0_41 = arith.constant 0 : index
      %50 = vector.load %arg11[%c0_39, %c0_40, %c0_41] : memref<1x1x128xf32, #tpu.memory_space<vmem>>, vector<1x1x128xf32>
      tpu.vector_store %arg11[%c0_39, %c0_40, %c0_41], %49 {strides = array<i32>} : memref<1x1x128xf32, #tpu.memory_space<vmem>>, vector<1x1x128xf32>,
    } else {
    }
    return
  }
  func.func @transform_0(%arg0: i32, %arg1: i32) -> (i32, i32, i32) {
    %c0_i32 = arith.constant 0 : i32
    %c0_i32_0 = arith.constant 0 : i32
    return %arg0, %arg1, %c0_i32 : i32, i32, i32
  }
  func.func @transform_1(%arg0: i32, %arg1: i32) -> (i32, i32) {
    %c0_i32 = arith.constant 0 : i32
    %c0_i32_0 = arith.constant 0 : i32
    %c0_i32_1 = arith.constant 0 : i32
    return %c0_i32, %c0_i32_0 : i32, i32
  }
  func.func @transform_2(%arg0: i32, %arg1: i32) -> (i32, i32) {
    %c0_i32 = arith.constant 0 : i32
    %c0_i32_0 = arith.constant 0 : i32
    %c0_i32_1 = arith.constant 0 : i32
    return %c0_i32, %c0_i32_0 : i32, i32
  }
  func.func @transform_3(%arg0: i32, %arg1: i32) -> (i32, i32) {
    %c0_i32 = arith.constant 0 : i32
    %c0_i32_0 = arith.constant 0 : i32
    %c0_i32_1 = arith.constant 0 : i32
    return %c0_i32, %c0_i32_0 : i32, i32
  }
  func.func @transform_4(%arg0: i32, %arg1: i32) -> (i32, i32) {
    %c0_i32 = arith.constant 0 : i32
    %c0_i32_0 = arith.constant 0 : i32
    %c0_i32_1 = arith.constant 0 : i32
    return %c0_i32, %c0_i32_0 : i32, i32
  }
  func.func @transform_5(%arg0: i32, %arg1: i32) -> (i32, i32) {
    %c0_i32 = arith.constant 0 : i32
    %c0_i32_0 = arith.constant 0 : i32
    %c0_i32_1 = arith.constant 0 : i32
    return %c0_i32, %c0_i32_0 : i32, i32
  }
  func.func @transform_6(%arg0: i32, %arg1: i32) -> (i32, i32) {
    %c0_i32 = arith.constant 0 : i32
    %c0_i32_0 = arith.constant 0 : i32
    %c0_i32_1 = arith.constant 0 : i32
    return %c0_i32, %c0_i32_0 : i32, i32
  }
  func.func @transform_7(%arg0: i32, %arg1: i32) -> (i32, i32) {
    %c0_i32 = arith.constant 0 : i32
    %c0_i32_0 = arith.constant 0 : i32
    %c0_i32_1 = arith.constant 0 : i32
    return %c0_i32, %c0_i32_0 : i32, i32
  }
  func.func @transform_8(%arg0: i32, %arg1: i32) -> (i32, i32) {
    %c0_i32 = arith.constant 0 : i32
    %c0_i32_0 = arith.constant 0 : i32
    %c0_i32_1 = arith.constant 0 : i32
    return %c0_i32, %c0_i32_0 : i32, i32
  }
  func.func @transform_9(%arg0: i32, %arg1: i32) -> (i32, i32, i32) {
    %c0_i32 = arith.constant 0 : i32
    %c0_i32_0 = arith.constant 0 : i32
    %c0_i32_1 = arith.constant 0 : i32
    return %arg0, %c0_i32, %c0_i32_0 : i32, i32, i32
  }
  func.func @transform_10(%arg0: i32, %arg1: i32) -> (i32, i32, i32) {
    %c0_i32 = arith.constant 0 : i32
    %c0_i32_0 = arith.constant 0 : i32
    %c0_i32_1 = arith.constant 0 : i32
    return %arg0, %c0_i32, %c0_i32_0 : i32, i32, i32
  }
}

</mosaic_0001>

<bundles_post_ra>
// kernel: tile.8
= control target key start
LH: loop header
LB: loop body
LE: loop exit
PB: predicated region body
PF: predicated region fallthrough
CT: control target
= control target key end

     0   :  { %s22_s0 = inlined_call_operand.vmem [shape: f32[16], index: 0, kind: input, shape index: {}]   ;;  %s23_s1 = inlined_call_operand.vmem [shape: f32[4,16], index: 1, kind: output, shape index: {}]  }
   0x1   :  { %v4_v0 = vld [vmem:[%s22_s0] ss:$0 sm:$0xff] }
   0x2   :  { %5 = vst [vmem:[%s23_s1] sm:$0xf] %v4_v0 }

// kernel: tile.9
= control target key start
LH: loop header
LB: loop body
LE: loop exit
PB: predicated region body
PF: predicated region fallthrough
CT: control target
= control target key end

     0   :  { %vm7_vm0 = vcmask 130048   ;;  %s37_s8 = smov 16   ;;  %s38_s9 = smov 32   ;;  %vm13_vm1 = vcmask 523648   ;;  %vm19_vm2 = vcmask 392448   ;;  %vm25_vm3 = vcmask 261248   ;;  %s55_s0 = inlined_call_operand.vmem [shape: f32[4,16], index: 0, kind: input, shape index: {}]   ;;  %s56_s1 = inlined_call_operand.vmem [shape: f32[1,64], index: 1, kind: output, shape index: {}]  }
   0x1   :  { %v4_v0 = vld [vmem:[%s55_s0] sm:$0xf]  ;;  %s36_s0 = smov 48  }
   0x2   :  { %5 = vst [vmem:[#allocation1] sm:$0xf] %v4_v0 }
   0x9   :  { %v10_v1 = vld [vmem:[#allocation1 + $0x3] sm:$0x1]   ;;  %v22_v2 = vld [vmem:[#allocation1 + $0x1] sm:$0x1]   ;;  %v6_v3 = vld [vmem:[#allocation1] sm:$0x1]  }
   0xa   :  { %11 = vrot.lane.b32.xlu0 %v10_v1, %s36_s0  ;;  %23 = vrot.lane.b32.xlu1 %v22_v2, %s37_s8  ;;  %v16_v4 = vld [vmem:[#allocation1 + $0x2] sm:$0x1]   ;;  %8 = vst.msk [vmem:[#allocation0] sm:$0x1] %vm7_vm0, %v6_v3  }
   0xe   :  { %17 = vrot.lane.b32.xlu0 %v16_v4, %s38_s9 }
  0x7c   :  { %v12_v5 = vpop.permute.xlu0 %11   ;;  %v24_v6 = vpop.permute.xlu1 %23  }
  0x7d   :  { %14 = vst.msk [vmem:[#allocation0] sm:$0x1] %vm13_vm1, %v12_v5  }
  0x80   :  { %v18_v7 = vpop.permute.xlu0 %17  }
  0x81   :  { %20 = vst.msk [vmem:[#allocation0] sm:$0x1] %vm19_vm2, %v18_v7  }
  0x82   :  { %26 = vst.msk [vmem:[#allocation0] sm:$0x1] %vm25_vm3, %v24_v6  }
  0x89   :  { %v30_v8 = vld [vmem:[#allocation0] sm:$0x1] }
  0x8a   :  { %32 = vst [vmem:[%s56_s1] sm:$0x1] %v30_v8 }

// kernel: pretraining_net_forward.1
= control target key start
LH: loop header
LB: loop body
LE: loop exit
PB: predicated region body
PF: predicated region fallthrough
CT: control target
= control target key end

     0   :  { %s2211_s0 = inlined_call_operand.vmem [shape: f32[2,16,32], index: 0, kind: input, shape index: {}]   ;;  %s2212_s1 = inlined_call_operand.vmem [shape: f32[32,64], index: 1, kind: input, shape index: {}]   ;;  %s2213_s2 = inlined_call_operand.vmem [shape: f32[1,64], index: 2, kind: input, shape index: {}]   ;;  %s2214_s3 = inlined_call_operand.vmem [shape: bf16[64,512], index: 3, kind: input, shape index: {}]   ;;  %s2215_s4 = inlined_call_operand.vmem [shape: f32[1,512], index: 4, kind: input, shape index: {}]   ;;  %s2216_s5 = inlined_call_operand.vmem [shape: bf16[512,128], index: 5, kind: input, shape index: {}]   ;;  %s2217_s6 = inlined_call_operand.vmem [shape: f32[1,128], index: 6, kind: input, shape index: {}]   ;;  %s2218_s7 = inlined_call_operand.vmem [shape: bf16[128,128], index: 7, kind: input, shape index: {}]   ;;  %s2219_s8 = inlined_call_operand.vmem [shape: f32[1,128], index: 8, kind: input, shape index: {}]   ;;  %s2220_s9 = inlined_call_operand.hbm [shape: f32[2,1,128], index: 9, kind: output, shape index: {0}]   ;;  %s2221_s10 = inlined_call_operand.hbm [shape: f32[2,1,128], index: 10, kind: output, shape index: {1}]  }
   0x1   :  { %2223 = sst [smem:[#allocation9_spill]] %s2211_s0 }
   0x2   :  { %2224 = sst [smem:[#allocation10_spill]] %s2212_s1 }
   0x3   :  { %16 = vsyncpa [#allocation4], 0 }
   0x4   :  { %18 = vsyncpa [#allocation4 + $0x1], 0 }
   0x5   :  { %19 = vsyncpa [#allocation6], 0 }
   0x6   :  { %21 = vsyncpa [#allocation6 + $0x1], 0  ;;  %s1860_s13 = smov 0   ;;  %s1862_s14 = smov 0  }
   0x7   :  { %s1864_s15 = smov 0   ;;  %s1866_s16 = smov 0  }
   0x8   :  { %s1868_s17 = smov 0   ;;  %s1870_s18 = smov 0  }
   0x9 LB: > { %s1390_s19 = sadd.s32 4294967295, %s1798_s18   ;;  %s1391_s20 = sadd.s32 4294967294, %s1798_s18   ;;  %s1798_s18 = sphi %s1870_s18, %s27_s18   ;;  %s1794_s17 = sphi %s1868_s17, %s2234_s17   ;;  %s1790_s16 = sphi %s1866_s16, %s2233_s16   ;;  %s1786_s15 = sphi %s1864_s15, %s2232_s15   ;;  %s1782_s14 = sphi %s1862_s14, %s2231_s14   ;;  %s1778_s13 = sphi %s1860_s13, %s2230_s13  }
   0xa   : > { %s39_s21 = sadd.s32 1, %s1794_s17  ;;  %s242_s22 = sadd.s32 1, %s1786_s15 }
   0xb   : > { %p41_p0 = scmp.ge.s32.totalorder %s39_s21, 2  ;;  %p252_p1 = scmp.ne.s32.totalorder %s1786_s15, %s1782_s14 }
   0xc   : > { %p253_p2 = scmp.eq.s32.totalorder %s1390_s19, 1  ;;  %p258_p3 = scmp.ne.s32.totalorder %s1782_s14, %s1778_s13 }
   0xd   : > { %s2236_s21 = smov (%p41_p0, %s39_s21), 0  ;;  %p259_p5 = scmp.eq.s32.totalorder %s1391_s20, 1 }
   0xe   : > { %p1900_p4 = por %p253_p2, %p252_p1  ;;  %s239_s24 = ssub.s32 %s1794_s17, %s2236_s21 }
   0xf   : > { %p1394_p6 = scmp.ge.s32.totalorder %s1798_s18, 1  ;;  %p240_p7 = scmp.eq.s32.totalorder %s239_s24, 0 }
  0x10   : > { %p1907_p8 = por %p259_p5, %p258_p3  ;;  %p340_p9 = scmp.lt.s32.totalorder %s1798_s18, 3 }
  0x11   : > { %s1913_s26 = scalar_select %p240_p7, %s1786_s15, %s242_s22  }
  0x12   : > { %p341_p10 = pnand %p1394_p6, %p340_p9 }
  0x13   : > { %s2227_s1 = sld [smem:[#allocation10_spill]] (!%p341_p10)  ;;  %p386_p11 = scmp.lt.s32.totalorder (!%p341_p10), %s1790_s16, 1  ;;  %vm417_vm0 = vcmask (!%p341_p10), 261120   ;;  %v1626_v6 = vld [vmem:[%s2214_s3 + $0x4] ss:$16 sps:$4 sm:$0xff] (!%p341_p10)   ;;  %v1800_v17 = vmov (!%p341_p10), 0  }
  0x14   : > { %344 = sbr.rel (%p341_p10) target bundleno = 959 (0x3bf), region = 56  ;;  %s2228_s0 = sld [smem:[#allocation9_spill]] (!%p341_p10)  ;;  %v1624_v9 = vld [vmem:[%s2214_s3] ss:$16 sps:$4 sm:$0xff] (!%p341_p10)   ;;  %v1629_v10 = vld [vmem:[%s2214_s3 + $0x24] ss:$16 sps:$4 sm:$0xff] (!%p341_p10)  }
  0x15   : > { %v1627_v11 = vld [vmem:[%s2214_s3 + $0x20] ss:$16 sps:$4 sm:$0xff] (!%p341_p10)   ;;  %v1632_v12 = vld [vmem:[%s2214_s3 + $0x44] ss:$16 sps:$4 sm:$0xff] (!%p341_p10)   ;;  %v1638_v16 = vld [vmem:[%s2214_s3 + $0xc] ss:$16 sps:$4 sm:$0xff] (!%p341_p10)  }
  0x16   : > { %v1630_v13 = vld [vmem:[%s2214_s3 + $0x40] ss:$16 sps:$4 sm:$0xff] (!%p341_p10)   ;;  %v1635_v14 = vld [vmem:[%s2214_s3 + $0x64] ss:$16 sps:$4 sm:$0xff] (!%p341_p10)   ;;  %v1636_v27 = vld [vmem:[%s2214_s3 + $0x8] ss:$16 sps:$4 sm:$0xff] (!%p341_p10)  }
  0x17   : > { %v1633_v15 = vld [vmem:[%s2214_s3 + $0x60] ss:$16 sps:$4 sm:$0xff] (!%p341_p10)   ;;  %vm620_vm1 = vcmask (!%p341_p10), 523264   ;;  %v1641_v29 = vld [vmem:[%s2214_s3 + $0x2c] ss:$16 sps:$4 sm:$0xff] (!%p341_p10)   ;;  %vm1802_vm3 = vmmov (!%p341_p10), 0  }
  0x18   : > { %v1648_v18 = vld [vmem:[%s2216_s5 + $0x40] sm:$0xff] (!%p341_p10)   ;;  %v1639_v30 = vld [vmem:[%s2214_s3 + $0x28] ss:$16 sps:$4 sm:$0xff] (!%p341_p10)   ;;  %v1644_v31 = vld [vmem:[%s2214_s3 + $0x4c] ss:$16 sps:$4 sm:$0xff] (!%p341_p10)  }
  0x19   : > { %v406_v0 = vld [vmem:[%s2227_s1] sm:$0xff] (!%p341_p10)  ;;  %v407_v1 = vld [vmem:[%s2227_s1 + $0x8] sm:$0xff] (!%p341_p10)  ;;  %v408_v2 = vld [vmem:[%s2227_s1 + $0x10] sm:$0xff] (!%p341_p10)  ;;  %1469 = vmatprep.subr.bf16.mxu1 (!%p341_p10), %v1648_v18 }
  0x1a   : > { %v1553_v3 = vpack.c.bf16 (!%p341_p10), %v407_v1, %v406_v0  ;;  %v409_v4 = vld [vmem:[%s2227_s1 + $0x18] sm:$0xff] (!%p341_p10)  ;;  %v1649_v19 = vld [vmem:[%s2216_s5] sm:$0xff] (!%p341_p10)   ;;  %v1650_v35 = vld [vmem:[%s2216_s5 + $0x48] sm:$0xff] (!%p341_p10)   ;;  %v1801_v1 = vmov (!%p341_p10), 0.0  }
  0x1b   : > { %v1557_v5 = vpack.c.bf16 %v409_v4, %v408_v2  ;;  %s387_s22 = scalar_select %p386_p11, %s1790_s16, 1  ;;  %1470 = vmatpush3.bf16.msra.mxu1 %v1649_v19  ;;  %v1397_v20 = vld [vmem:[%s2213_s2] ss:$0 sm:$0xff]  ;;  %v1642_v32 = vld [vmem:[%s2214_s3 + $0x48] ss:$16 sps:$4 sm:$0xff]   ;;  %v1652_v37 = vld [vmem:[%s2216_s5 + $0x50] sm:$0xff]   ;;  %v520_v2 = vlaneseq }
  0x1c   : > { %1554 = vmatprep.subr.bf16.mxu0 %v1553_v3  ;;  %v1647_v33 = vld [vmem:[%s2214_s3 + $0x6c] ss:$16 sps:$4 sm:$0xff]   ;;  %v1645_v34 = vld [vmem:[%s2214_s3 + $0x68] ss:$16 sps:$4 sm:$0xff]   ;;  %1471 = vmatprep.subr.bf16.mxu1 %v1650_v35  ;;  %v1653_v38 = vld [vmem:[%s2216_s5 + $0x10] sm:$0xff]  }
  0x1d   : > { %1556 = vmatpush3.bf16.msra.mxu0 %v1553_v3  ;;  %s1462_s24 = sshll.u32 %s387_s22, 4  ;;  %v1651_v36 = vld [vmem:[%s2216_s5 + $0x8] sm:$0xff]   ;;  %v1654_v39 = vld [vmem:[%s2216_s5 + $0x58] sm:$0xff]   ;;  %v1656_v41 = vld [vmem:[%s2216_s5 + $0xc0] sm:$0xff]   ;;  %v521_v3 = vshrl.u32 %v520_v2, 7  ;;  %s1803_s22 = smov [#allocation5]  }
  0x1e   : > { %1558 = vmatprep.subr.bf16.mxu0 %v1557_v5  ;;  %s393_s29 = scalar_lea.vmem %s2228_s0, %s1462_s24  ;;  %v1655_v40 = vld [vmem:[%s2216_s5 + $0x18] sm:$0xff]   ;;  %v1657_v42 = vld [vmem:[%s2216_s5 + $0x60] sm:$0xff]   ;;  %v1660_v45 = vld [vmem:[%s2216_s5 + $0xc8] sm:$0xff]   ;;  %s2125_s24 = sand.u32 1, %s1782_s14  }
  0x1f   : > { %v404_v7 = vld [vmem:[%s393_s29] sm:$0xff]  ;;  %v405_v8 = vld [vmem:[%s393_s29 + $0x8] sm:$0xff]  ;;  %1472 = vmatpush3.bf16.msra.mxu1 %v1651_v36  ;;  %v1664_v49 = vld [vmem:[%s2216_s5 + $0xd0] sm:$0xff]   ;;  %v522_v4 = vsub.s32 0, %v521_v3  ;;  %s384_s28 = scalar_lea.vmem [#allocation5], %s2125_s24  ;;  %s2222_s29 = sshll.u32 %s1790_s16, 4 }
  0x20   : > { %1530 = vmatprep.mubr.msk.f32.mxu0 %vm417_vm0, %v404_v7  ;;  %1473 = vmatprep.subr.bf16.mxu1 %v1652_v37  ;;  %v1658_v43 = vld [vmem:[%s2216_s5 + $0x80] sm:$0xff]   ;;  %v1661_v46 = vld [vmem:[%s2216_s5 + $0x68] sm:$0xff]   ;;  %v1665_v50 = vld [vmem:[%s2216_s5 + $0x70] sm:$0xff]   ;;  %s2134_s11 = scalar_lea.hbm %s2221_s10, %s2222_s29  ;;  %s1293_s12 = sshll.u32 %s384_s28, 4  ;;  %s1294_s12 = int_to_ptr.vmem [resolvable:$true] %s1293_s12 }
  0x21   : > { %1560 = vmatpush3.bf16.msra.mxu0 %v1557_v5  ;;  %v1659_v44 = vld [vmem:[%s2216_s5 + $0x20] sm:$0xff]   ;;  %v1662_v47 = vld [vmem:[%s2216_s5 + $0x88] sm:$0xff]   ;;  %v1666_v51 = vld [vmem:[%s2216_s5 + $0x90] sm:$0xff]   ;;  %s1268_s19 = scalar_lea.sflag [#allocation6], %s2125_s24  ;;  %s1688_s20 = scalar_lea.vmem %s1294_s12, 16 }
  0x22   : > { %624 = vmatprep.subr.bf16.mxu0 %v1626_v6  ;;  %v1663_v48 = vld [vmem:[%s2216_s5 + $0x28] sm:$0xff]   ;;  %v1667_v52 = vld [vmem:[%s2216_s5 + $0x30] sm:$0xff]   ;;  %v1668_v53 = vld [vmem:[%s2216_s5 + $0xd8] sm:$0xff]   ;;  %v526_v6 = vsub.s32 1, %v521_v3  ;;  %p1689_p12 = scmp.ne.s32.totalorder %s1294_s12, %s1688_s20  ;;  %s1692_s27 = sshll.u32 %s1803_s22, 4  ;;  %s1693_s27 = int_to_ptr.vmem [resolvable:$false] %s1692_s27 }
  0x23   : > { %1474 = vmatpush3.bf16.msra.mxu1 %v1653_v38  ;;  %v1669_v54 = vld [vmem:[%s2216_s5 + $0x78] sm:$0xff]   ;;  %v1672_v57 = vld [vmem:[%s2216_s5 + $0xe0] sm:$0xff]   ;;  %v1674_v59 = vld [vmem:[%s2216_s5 + $0xe8] sm:$0xff]   ;;  %s1694_s0 = scalar_lea.vmem %s1693_s27, 32  ;;  %p1695_p1 = scmp.lt.s32.totalorder %s1294_s12, %s1693_s27 }
  0x24   : > { %1531 = vmatmul.mubr.msk.f32.vlgmr.msra.gmra.mrb[0].mxu0 %vm417_vm0, %v405_v8  ;;  %1475 = vmatprep.subr.bf16.mxu1 %v1654_v39  ;;  %v1670_v55 = vld [vmem:[%s2216_s5 + $0x98] sm:$0xff]   ;;  %v1673_v58 = vld [vmem:[%s2216_s5 + $0xa0] sm:$0xff]   ;;  %v1675_v60 = vld [vmem:[%s2216_s5 + $0xa8] sm:$0xff]   ;;  %p1690_p13 = pnand %p1689_p12, %p1900_p4  ;;  %p1696_p2 = scmp.lt.s32.totalorder %s1694_s0, %s1688_s20 }
  0x25   : > { %625 = vmatpush1.bf16.msra.mxu0 %v1624_v9  ;;  %656 = vmatprep.mubr.bf16.mxu0 %v1800_v17  ;;  %v1671_v56 = vld [vmem:[%s2216_s5 + $0x38] sm:$0xff]   ;;  %v1676_v61 = vld [vmem:[%s2216_s5 + $0xf0] sm:$0xff]   ;;  %v518_v5 = vld [vmem:[%s2215_s4] sm:$0xf] }
  0x26   : > { %626 = vmatprep.subr.bf16.mxu0 %v1629_v10  ;;  %v1677_v62 = vld [vmem:[%s2216_s5 + $0xb0] sm:$0xff]   ;;  %v1678_v63 = vld [vmem:[%s2216_s5 + $0xf8] sm:$0xff]   ;;  %v523_v7 = vrot.slane %v518_v5, %v522_v4  ;;  %v527_v8 = vrot.slane %v518_v5, %v526_v6  ;;  %v724_v10 = vadd.s32 8, %v521_v3  ;;  %v1681_v4 = vld [vmem:[%s2218_s7 + $0x8] sm:$0xff]   ;;  %p1691_p0 = pneg %p1690_p13  ;;  %p1697_p3 = por %p1696_p2, %p1695_p1 }
  0x27   : > { %1476 = vmatpush3.bf16.msra.mxu1 %v1655_v40  ;;  %v1679_v0 = vld [vmem:[%s2216_s5 + $0xb8] sm:$0xff]  }
  0x28   : > { %1477 = vmatprep.subr.bf16.mxu1 %v1657_v42  ;;  %vm729_vm2 = vcmp.lt.s32.totalorder %v724_v10, 14  ;;  %p1698_p5 = pnand %p1697_p3, %p1691_p0 }
  0x29   : > { %627 = vmatpush1.bf16.msra.mxu0 %v1627_v11 }
  0x2a   : > { %628 = vmatprep.subr.bf16.mxu0 %v1632_v12 }
  0x2b   : > { %1478 = vmatpush3.bf16.msra.mxu1 %v1659_v44 }
  0x2c   : > { %1479 = vmatprep.subr.bf16.mxu1 %v1661_v46 }
  0x2d   : > { %629 = vmatpush1.bf16.msra.mxu0 %v1630_v13 }
  0x2e   : > { %630 = vmatprep.subr.bf16.mxu0 %v1635_v14 }
  0x2f   : > { %1480 = vmatpush3.bf16.msra.mxu1 %v1663_v48 }
  0x30   : > { %1481 = vmatprep.subr.bf16.mxu1 %v1665_v50 }
  0x31   : > { %631 = vmatpush1.bf16.msra.mxu0 %v1633_v15 }
  0x32   : > { %667 = vmatprep.subr.bf16.mxu0 %v1638_v16 }
  0x33   : > { %1482 = vmatpush3.bf16.msra.mxu1 %v1667_v52 }
  0x34   : > { %1483 = vmatprep.subr.bf16.mxu1 %v1669_v54 }
  0x37   : > { %1484 = vmatpush3.bf16.msra.mxu1 %v1671_v56 }
  0x38   : > { %1533 = vmatprep.subr.bf16.mxu1 %v1801_v1 }
  0xf7   : > { %v1532_v21 = vpop.f32.mrb[0].mxu0 }
  0xf8   : > { %v496_v22 = vadd.f32 %v1532_v21, %v1397_v20  ;;  %v490_v23 = vpop.f32.mrb[1].mxu0 }
  0xf9   : > { %v491_v24 = vadd.f32 %v1397_v20, %v490_v23 }
  0xfa   : > { %v500_v25 = vmax.f32 %v496_v22, 0.0 }
  0xfb   : > { %v499_v26 = vmax.f32 %v491_v24, 0.0 }
  0xfd   : > { %v501_v28 = vpack.c.bf16 %v500_v25, %v499_v26 }
  0xff   : > { %1416 = vmatmul.mubr.msk.bf16.vlgmr.msra.gmra.mrb[4].mxu0 %vm620_vm1, %v501_v28 }
 0x100   : > { %668 = vmatpush1.bf16.msra.mxu0 %v1636_v27  ;;  %699 = vmatprep.mubr.bf16.mxu0 %v1800_v17  ;;  %v530_v27 = vsub.s32 2, %v521_v3 }
 0x101   : > { %669 = vmatprep.subr.bf16.mxu0 %v1641_v29  ;;  %v534_v29 = vsub.s32 3, %v521_v3 }
 0x104   : > { %670 = vmatpush1.bf16.msra.mxu0 %v1639_v30 }
 0x105   : > { %671 = vmatprep.subr.bf16.mxu0 %v1644_v31 }
 0x108   : > { %672 = vmatpush1.bf16.msra.mxu0 %v1642_v32 }
 0x109   : > { %673 = vmatprep.subr.bf16.mxu0 %v1647_v33  ;;  %v531_v33 = vrot.slane %v518_v5, %v530_v27 }
 0x10c   : > { %674 = vmatpush1.bf16.msra.mxu0 %v1645_v34  ;;  %v535_v34 = vrot.slane %v518_v5, %v534_v29 }
 0x10d   : > { %1491 = vmatprep.subr.bf16.mxu0 %v1656_v41 }
 0x10f   : > { %1417 = vmatmul.mubr.msk.bf16.vlgmr.msra.gmra.mrb[8].mxu0 %vm620_vm1, %v501_v28 }
 0x110   : > { %1492 = vmatpush3.bf16.msra.mxu0 %v1658_v43 }
 0x111   : > { %1493 = vmatprep.subr.bf16.mxu0 %v1660_v45 }
 0x114   : > { %1494 = vmatpush3.bf16.msra.mxu0 %v1662_v47 }
 0x115   : > { %1495 = vmatprep.subr.bf16.mxu0 %v1664_v49 }
 0x118   : > { %1496 = vmatpush3.bf16.msra.mxu0 %v1666_v51 }
 0x119   : > { %1497 = vmatprep.subr.bf16.mxu0 %v1668_v53 }
 0x11c   : > { %1498 = vmatpush3.bf16.msra.mxu0 %v1670_v55 }
 0x11d   : > { %1499 = vmatprep.subr.bf16.mxu0 %v1672_v57 }
 0x120   : > { %1500 = vmatpush3.bf16.msra.mxu0 %v1673_v58 }
 0x121   : > { %1501 = vmatprep.subr.bf16.mxu0 %v1674_v59 }
 0x124   : > { %1502 = vmatpush3.bf16.msra.mxu0 %v1675_v60 }
 0x125   : > { %1503 = vmatprep.subr.bf16.mxu0 %v1676_v61  ;;  %v1680_v61 = vld [vmem:[%s2218_s7] sm:$0xff]  }
 0x128   : > { %1504 = vmatpush3.bf16.msra.mxu0 %v1677_v62 }
 0x129   : > { %1505 = vmatprep.subr.bf16.mxu0 %v1678_v63 }
 0x12c   : > { %1506 = vmatpush3.bf16.msra.mxu0 %v1679_v0 }
 0x1d2   : > { %v658_v9 = vpop.f32.mrb[4].mxu0 }
 0x1d3   : > { %v660_v11 = vpop.f32.mrb[5].mxu0  ;;  %v659_v12 = vadd.f32 %v658_v9, %v523_v7 }
 0x1d4   : > { %v662_v13 = vpop.f32.mrb[6].mxu0  ;;  %v661_v14 = vadd.f32 %v660_v11, %v527_v8 }
 0x1d5   : > { %v663_v15 = vadd.f32 %v662_v13, %v523_v7  ;;  %v664_v16 = vpop.f32.mrb[7].mxu0  ;;  %v710_v19 = vmax.f32 %v659_v12, 0.0 }
 0x1d6   : > { %v665_v17 = vadd.f32 %v664_v16, %v527_v8  ;;  %v711_v21 = vmax.f32 %v661_v14, 0.0 }
 0x1d7   : > { %v714_v18 = vmax.f32 %v663_v15, 0.0 }
 0x1d8   : > { %v715_v20 = vmax.f32 %v665_v17, 0.0  ;;  %v1682_v17 = vld [vmem:[%s2218_s7 + $0x10] sm:$0xff]  }
 0x1d9   : > { %v738_v22 = vsel %vm729_vm2, %v714_v18, 0.0  ;;  %v1683_v18 = vld [vmem:[%s2218_s7 + $0x18] sm:$0xff]  }
 0x1da   : > { %v746_v23 = vadd.f32 %v738_v22, %v710_v19  ;;  %v739_v24 = vsel %vm729_vm2, %v715_v20, 0.0  ;;  %v1684_v19 = vld [vmem:[%s2218_s7 + $0x20] sm:$0xff]   ;;  %v1685_v20 = vld [vmem:[%s2218_s7 + $0x28] sm:$0xff]   ;;  %v1687_v22 = vld [vmem:[%s2218_s7 + $0x38] sm:$0xff]  }
 0x1db   : > { %v747_v25 = vadd.f32 %v739_v24, %v711_v21  ;;  %v1686_v21 = vld [vmem:[%s2218_s7 + $0x30] sm:$0xff]  }
 0x1dc   : > { %v785_v26 = vrot.slane %v746_v23, 4 }
 0x1dd   : > { %v791_v28 = vrot.slane %v747_v25, 4 }
 0x1de   : > { %v786_v30 = vadd.f32 %v785_v26, %v746_v23 }
 0x1df   : > { %v792_v31 = vadd.f32 %v791_v28, %v747_v25  ;;  %v881_v28 = vld [vmem:[%s2217_s6] sm:$0x1] }
 0x1e0   : > { %v787_v32 = vrot.slane %v786_v30, 2 }
 0x1e1   : > { %v793_v35 = vrot.slane %v792_v31, 2 }
 0x1e2   : > { %v701_v36 = vpop.f32.mrb[8].mxu0  ;;  %v788_v37 = vadd.f32 %v787_v32, %v786_v30 }
 0x1e3   : > { %v703_v38 = vpop.f32.mrb[9].mxu0  ;;  %v794_v39 = vadd.f32 %v793_v35, %v792_v31  ;;  %v702_v40 = vadd.f32 %v701_v36, %v531_v33 }
 0x1e4   : > { %v705_v41 = vpop.f32.mrb[10].mxu0  ;;  %v789_v42 = vrot.slane %v788_v37, 1  ;;  %v704_v43 = vadd.f32 %v703_v38, %v535_v34 }
 0x1e5   : > { %v706_v44 = vadd.f32 %v705_v41, %v531_v33  ;;  %v707_v45 = vpop.f32.mrb[11].mxu0  ;;  %v795_v46 = vrot.slane %v794_v39, 1  ;;  %v712_v51 = vmax.f32 %v702_v40, 0.0 }
 0x1e6   : > { %v708_v47 = vadd.f32 %v707_v45, %v535_v34  ;;  %v790_v48 = vadd.f32 %v789_v42, %v788_v37  ;;  %v713_v54 = vmax.f32 %v704_v43, 0.0 }
 0x1e7   : > { %v716_v49 = vmax.f32 %v706_v44, 0.0  ;;  %v796_v50 = vadd.f32 %v795_v46, %v794_v39 }
 0x1e8   : > { %v717_v52 = vmax.f32 %v708_v47, 0.0  ;;  %v809_v53 = vmul.f32 0.071428575, %v790_v48 }
 0x1e9   : > { %v740_v55 = vsel %vm729_vm2, %v716_v49, 0.0  ;;  %v810_v56 = vmul.f32 0.071428575, %v796_v50 }
 0x1ea   : > { %v748_v57 = vadd.f32 %v740_v55, %v712_v51  ;;  %v741_v58 = vsel %vm729_vm2, %v717_v52, 0.0  ;;  %v813_v63 = vpack.c.bf16 %v809_v53, %v809_v53 }
 0x1eb   : > { %v749_v59 = vadd.f32 %v741_v58, %v713_v54  ;;  %v814_v60 = vpack.c.bf16 %v810_v56, %v810_v56 }
 0x1ec   : > { %v797_v62 = vrot.slane %v748_v57, 4 }
 0x1ed   : > { %v803_v0 = vrot.slane %v749_v59, 4  ;;  %1106 = vmatprep.mubr.bf16.mxu1 %v814_v60 }
 0x1ee   : > { %v798_v2 = vadd.f32 %v797_v62, %v748_v57  ;;  %1107 = vmatmul.mubr.bf16.vlgmr.msra.gmra.mrb[0].mxu1 %v813_v63 }
 0x1ef   : > { %v804_v3 = vadd.f32 %v803_v0, %v749_v59  ;;  %1534 = vmatpush3.bf16.msra.mxu1 %v1680_v61  ;;  %1549 = vmatprep.mubr.msk.bf16.mxu1 %vm1802_vm3, %v1801_v1 }
 0x1f0   : > { %v799_v5 = vrot.slane %v798_v2, 2  ;;  %1535 = vmatprep.subr.bf16.mxu1 %v1801_v1 }
 0x1f1   : > { %v805_v6 = vrot.slane %v804_v3, 2 }
 0x1f2   : > { %v800_v7 = vadd.f32 %v799_v5, %v798_v2 }
 0x1f3   : > { %v806_v8 = vadd.f32 %v805_v6, %v804_v3  ;;  %1536 = vmatpush3.bf16.msra.mxu1 %v1681_v4 }
 0x1f4   : > { %v801_v9 = vrot.slane %v800_v7, 1  ;;  %1537 = vmatprep.subr.bf16.mxu1 %v1801_v1 }
 0x1f5   : > { %v807_v10 = vrot.slane %v806_v8, 1 }
 0x1f6   : > { %v802_v11 = vadd.f32 %v801_v9, %v800_v7 }
 0x1f7   : > { %v808_v12 = vadd.f32 %v807_v10, %v806_v8  ;;  %1538 = vmatpush3.bf16.msra.mxu1 %v1682_v17 }
 0x1f8   : > { %v811_v13 = vmul.f32 0.071428575, %v802_v11  ;;  %1539 = vmatprep.subr.bf16.mxu1 %v1801_v1 }
 0x1f9   : > { %v812_v14 = vmul.f32 0.071428575, %v808_v12 }
 0x1fa   : > { %v815_v16 = vpack.c.bf16 %v811_v13, %v811_v13 }
 0x1fb   : > { %v816_v15 = vpack.c.bf16 %v812_v14, %v812_v14  ;;  %1540 = vmatpush3.bf16.msra.mxu1 %v1683_v18 }
 0x1fc   : > { %1541 = vmatprep.subr.bf16.mxu1 %v1801_v1 }
 0x1fd   : > { %1146 = vmatprep.mubr.bf16.mxu0 %v816_v15 }
 0x1fe   : > { %1147 = vmatmul.mubr.bf16.vlgmr.msra.gmra.mrb[12].mxu0 %v815_v16 }
 0x1ff   : > { %1542 = vmatpush3.bf16.msra.mxu1 %v1684_v19 }
 0x200   : > { %1543 = vmatprep.subr.bf16.mxu1 %v1801_v1 }
 0x203   : > { %1544 = vmatpush3.bf16.msra.mxu1 %v1685_v20 }
 0x204   : > { %1545 = vmatprep.subr.bf16.mxu1 %v1801_v1 }
 0x207   : > { %1546 = vmatpush3.bf16.msra.mxu1 %v1686_v21 }
 0x208   : > { %1547 = vmatprep.subr.bf16.mxu1 %v1801_v1 }
 0x20b   : > { %1548 = vmatpush3.bf16.msra.mxu1 %v1687_v22 }
 0x2c1   : > { %v1485_v23 = vpop.f32.mrb[0].mxu1 }
 0x2c2   : > { %v1486_v24 = vpop.f32.mrb[1].mxu1 }
 0x2c3   : > { %v1487_v25 = vadd.f32 %v1486_v24, %v1485_v23  ;;  %v1488_v26 = vpop.f32.mrb[2].mxu1 }
 0x2c4   : > { %v1489_v27 = vpop.f32.mrb[3].mxu1 }
 0x2c5   : > { %v1109_v31 = vadd.f32 %v1487_v25, %v881_v28 }
 0x2d1   : > { %v1507_v29 = vpop.f32.mrb[12].mxu0 }
 0x2d2   : > { %v1508_v30 = vpop.f32.mrb[13].mxu0 }
 0x2d3   : > { %v1509_v32 = vadd.f32 %v1508_v30, %v1507_v29  ;;  %v1510_v33 = vpop.f32.mrb[14].mxu0 }
 0x2d4   : > { %v1511_v1 = vpop.f32.mrb[15].mxu0 }
 0x2d5   : > { %v1149_v34 = vadd.f32 %v1509_v32, %v1109_v31 }
 0x2d7   : > { %v1154_v35 = vmax.f32 %v1149_v34, 0.0 }
 0x2d9   : > { %v1156_v36 = vpack.c.bf16 %v1154_v35, %v1154_v35  ;;  %1155 = vst [vmem:[%s384_s28] sm:$0x1] %v1154_v35 }
 0x2db   : > { %1550 = vmatmul.mubr.bf16.vlgmr.msra.gmra.mrb[4].mxu1 %v1156_v36 }
 0x2dc   : > { %1701 = shalt.err (!%p1698_p5)
}
 0x2dd   : > { %s1702_s28 = scalar_lea.hbm %s2134_s11, 16  ;;  %s1706_s22 = scalar_lea.hbm %s2221_s10, 32 }
 0x2de   : > { %p1703_p6 = scmp.ne.s32.totalorder %s2134_s11, %s1702_s28  ;;  %p1707_p10 = scmp.lt.u32.totalorder %s2134_s11, %s2221_s10 }
 0x2df   : > { %p1708_p11 = scmp.lt.u32.totalorder %s1706_s22, %s1702_s28  ;;  %p1710_p13 = scmp.lt.u32.totalorder %s1702_s28, %s2134_s11 }
 0x2e0   : > { %p1704_p7 = pnand %p1703_p6, %p1900_p4 }
 0x2e1   : > { %p1709_p12 = por %p1708_p11, %p1707_p10 }
 0x2e2   : > { %p1705_p9 = pneg %p1704_p7 }
 0x2e3   : > { %p1711_p0 = por %p1710_p13, %p1709_p12 }
 0x2e5   : > { %p1712_p1 = pnand %p1711_p0, %p1705_p9 }
 0x2e7   : > { %1715 = shalt.err (!%p1712_p1)
}
 0x2e8   : > { %1562 = dma.vmem_to_hbm [thread:$0]  (%p1900_p4), %s1294_s12, 16, %s2134_s11, %s1268_s19   ;;  %v1173_v37 = vld [vmem:[%s2219_s8] sm:$0x1] }
 0x2e9   : > { %s378_s29 = scalar_lea.vmem [#allocation3], %s2125_s24  ;;  %s2229_s28 = sshll.u32 %s1790_s16, 4 }
 0x2ea   : > { %s1280_s30 = sshll.u32 %s378_s29, 4  ;;  %s2163_s27 = scalar_lea.hbm %s2220_s9, %s2229_s28  ;;  %s2165_s30 = int_to_ptr.vmem [resolvable:$true] %s1280_s30 }
 0x2eb   : > { %s1264_s11 = scalar_lea.sflag [#allocation4], %s2125_s24  ;;  %s1716_s12 = scalar_lea.vmem %s2165_s30, 16 }
 0x2ec   : > { %p1717_p2 = scmp.ne.s32.totalorder %s2165_s30, %s1716_s12  ;;  %s1804_s16 = smov [#allocation3]  }
 0x2ed   : > { %s1720_s19 = sshll.u32 %s1804_s16, 4  ;;  %s1721_s19 = int_to_ptr.vmem [resolvable:$false] %s1720_s19 }
 0x2ee   : > { %p1718_p3 = pnand %p1717_p2, %p1900_p4  ;;  %s1722_s0 = scalar_lea.vmem %s1721_s19, 32 }
 0x2ef   : > { %p1723_p6 = scmp.lt.s32.totalorder %s2165_s30, %s1721_s19  ;;  %p1724_p7 = scmp.lt.s32.totalorder %s1722_s0, %s1716_s12 }
 0x2f0   : > { %p1719_p5 = pneg %p1718_p3 }
 0x2f1   : > { %p1725_p9 = por %p1724_p7, %p1723_p6 }
 0x2f3   : > { %p1726_p10 = pnand %p1725_p9, %p1719_p5 }
 0x3ae   : > { %v1256_v38 = vpop.f32.mrb[4].mxu1 }
 0x3af   : > { %v1257_v39 = vadd.f32 %v1256_v38, %v1173_v37  ;;  %v1551_v40 = vpop.f32.mrb[5].mxu1 }
 0x3b0   : > { %v1259_v41 = vpop.f32.mrb[6].mxu1 }
 0x3b1   : > { %1262 = vst [vmem:[%s378_s29] sm:$0x1] %v1257_v39  ;;  %v1552_v42 = vpop.f32.mrb[7].mxu1 }
 0x3b2   : > { %1729 = shalt.err (!%p1726_p10)
}
 0x3b3   : > { %s1730_s24 = scalar_lea.hbm %s2163_s27, 16  ;;  %s1734_s28 = scalar_lea.hbm %s2220_s9, 32 }
 0x3b4   : > { %p1731_p11 = scmp.ne.s32.totalorder %s2163_s27, %s1730_s24  ;;  %p1735_p0 = scmp.lt.u32.totalorder %s2163_s27, %s2220_s9 }
 0x3b5   : > { %p1736_p1 = scmp.lt.u32.totalorder %s1734_s28, %s1730_s24  ;;  %p1738_p3 = scmp.lt.u32.totalorder %s1730_s24, %s2163_s27 }
 0x3b6   : > { %p1732_p12 = pnand %p1731_p11, %p1900_p4 }
 0x3b7   : > { %p1737_p2 = por %p1736_p1, %p1735_p0 }
 0x3b8   : > { %p1733_p13 = pneg %p1732_p12 }
 0x3b9   : > { %p1739_p5 = por %p1738_p3, %p1737_p2 }
 0x3bb   : > { %p1740_p6 = pnand %p1739_p5, %p1733_p13 }
 0x3bd   : > { %1743 = shalt.err (!%p1740_p6)
}
 0x3be   : > { %1561 = dma.vmem_to_hbm [thread:$0]  (%p1900_p4), %s2165_s30, 16, %s2163_s27, %s1264_s11  }
 0x3bf PF: > { %p1572_p7 = scmp.ge.s32.totalorder %s1798_s18, 2  ;;  %s1305_s12 = sand.u32 1, %s1778_s13  }
 0x3c0   : > { %s1306_s16 = scalar_lea.sflag [#allocation4], %s1305_s12 }
 0x3c1   : > { %p1566_p9 = pnand %p1572_p7, %p1907_p8 }
 0x3c3   : > { %1769 = dma.done.wait (!%p1566_p9), %s1306_s16, 16  }
 0x3c4   : > { %1771 = vsyncadd (!%p1566_p9), %s1306_s16, 4294967280  ;;  %s1314_s19 = scalar_lea.sflag [#allocation6], %s1305_s12 }
 0x3c5   : > { %1773 = dma.done.wait (!%p1566_p9), %s1314_s19, 16  }
 0x3c6   : > { %1775 = vsyncadd (!%p1566_p9), %s1314_s19, 4294967280  ;;  %s27_s18 = sadd.s32 1, %s1798_s18   ;;  %s2230_s13 = smov %s1782_s14 }
 0x3c7   : > { %p24_p10 = scmp.ge.s32.totalorder %s27_s18, 4   ;;  %s2231_s14 = smov %s1786_s15 }
 0x3c8   : > { %s2232_s15 = smov %s1913_s26  ;;  %s2233_s16 = smov %s1794_s17 }
 0x3c9   : > { %s2234_s17 = smov %s2236_s21  ;;  %26 = sbr.rel (!%p24_p10) target bundleno = 9 (0x9), region = 124 }
 0x3d0   :  { %1318 = vsyncpa [#allocation4], 1 }
 0x3d1   :  { %1320 = vsyncpa [#allocation4 + $0x1], 1 }
 0x3d2   :  { %1321 = vsyncpa [#allocation6], 1 }
 0x3d3   :  { %1323 = vsyncpa [#allocation6 + $0x1], 1 }

</bundles_post_ra>
